<compile_context>
chip_gen: v7x
topology: tpu7x:2x2x1
jax: 0.10.0
libtpu: 0.0.40
codegen_flags: <defaults>
</compile_context>

<pallas_src>
import functools
import math

import jax
import jax.numpy as jnp
from jax.experimental import pallas as pl
from jax.experimental.pallas import tpu as pltpu


def _fused_mlp_kernel(x_ref, w_in_ref, b_in_ref, w_hid_ref, b_hid_ref,
                      w_out_ref, b_out_ref, o_ref, *, num_hidden):
    """Whole-MLP tile: x_ref is (fin, tile_n) with batch on the lane axis.

    Each layer is  h_new = tanh(W @ h + b)  with W in PyTorch (fout, fin)
    layout and b broadcast over lanes; the output layer skips the tanh.
    The hidden activations stay in VMEM/vregs -- no HBM round trips.
    """
    # Input layer.
    h = jnp.dot(w_in_ref[...], x_ref[...], preferred_element_type=jnp.float32)
    h = jnp.tanh(h + b_in_ref[...])

    # Hidden layers (static unroll; num_hidden is a Python int).
    for l in range(num_hidden):
        h = jnp.dot(w_hid_ref[l], h, preferred_element_type=jnp.float32)
        h = jnp.tanh(h + b_hid_ref[l])

    # Output layer: no activation.
    y = jnp.dot(w_out_ref[...], h, preferred_element_type=jnp.float32)
    o_ref[...] = (y + b_out_ref[...]).astype(o_ref.dtype)


def mlp_forward(params, x, *, tile_n=512):
    """Pallas-backed MLP forward.

    params: list of (W, b) in PyTorch layout: W is (fan_out, fan_in), b is (fan_out,).
    x:      (N, in_features) row-major, like nn.Linear input.
    Returns (N, out_features).
    """
    x = x.astype(jnp.float32)
    n, fin = x.shape
    w_in, b_in = params[0]
    w_out, b_out = params[-1]
    hidden = params[1:-1]
    num_hidden = len(hidden)
    hdim = w_in.shape[0]
    fout = w_out.shape[0]

    # --- batch tiling: batch goes on the 128-lane axis ------------------------
    n128 = pl.cdiv(n, 128) * 128
    tile_n = min(tile_n, n128)          # multiple of 128 by construction
    n_pad = pl.cdiv(n, tile_n) * tile_n
    grid = n_pad // tile_n

    # Transposed, padded input: (fin, n_pad). Padded columns are zeros and are
    # sliced off the output below.
    xt = jnp.pad(x.T, ((0, 0), (0, n_pad - n)))

    # --- weights / biases in kernel layout ------------------------------------
    b_in2 = b_in.reshape(hdim, 1).astype(jnp.float32)
    b_out2 = b_out.reshape(fout, 1).astype(jnp.float32)
    if num_hidden > 0:
        w_hid = jnp.stack([w for (w, _) in hidden]).astype(jnp.float32)
        b_hid = jnp.stack([b for (_, b) in hidden]).reshape(num_hidden, hdim, 1)
        b_hid = b_hid.astype(jnp.float32)
        hid_stack = num_hidden
    else:
        # Dummy (never read) stack so shapes stay non-empty when there are
        # no hidden layers.
        w_hid = jnp.zeros((1, hdim, hdim), jnp.float32)
        b_hid = jnp.zeros((1, hdim, 1), jnp.float32)
        hid_stack = 1

    # --- cost estimate (advisory) ----------------------------------------------
    flops = 2 * n_pad * (fin * hdim + num_hidden * hdim * hdim + hdim * fout)
    transcendentals = n_pad * hdim * (num_hidden + 1)
    bytes_accessed = 4 * (fin * n_pad + fout * n_pad
                          + hdim * fin + hdim
                          + num_hidden * (hdim * hdim + hdim)
                          + fout * hdim + fout)

    kernel = functools.partial(_fused_mlp_kernel, num_hidden=num_hidden)
    out_t = pl.pallas_call(
        kernel,
        out_shape=jax.ShapeDtypeStruct((fout, n_pad), jnp.float32),
        grid_spec=pltpu.PrefetchScalarGridSpec(
            num_scalar_prefetch=0,
            grid=(grid,),
            in_specs=[
                # batch-tiled input, lane-dense
                pl.BlockSpec((fin, tile_n), lambda i: (0, i)),
                # weights/biases: full-array blocks, constant across the grid
                pl.BlockSpec((hdim, fin), lambda i: (0, 0)),
                pl.BlockSpec((hdim, 1), lambda i: (0, 0)),
                pl.BlockSpec((hid_stack, hdim, hdim), lambda i: (0, 0, 0)),
                pl.BlockSpec((hid_stack, hdim, 1), lambda i: (0, 0, 0)),
                pl.BlockSpec((fout, hdim), lambda i: (0, 0)),
                pl.BlockSpec((fout, 1), lambda i: (0, 0)),
            ],
            out_specs=pl.BlockSpec((fout, tile_n), lambda i: (0, i)),
        ),
        compiler_params=pltpu.CompilerParams(
            dimension_semantics=("parallel",),      # megacore / dual-TC sharding
            vmem_limit_bytes=32 * 1024 * 1024,      # plenty of headroom on v7x
        ),
        cost_estimate=pl.CostEstimate(
            flops=flops,
            transcendentals=transcendentals,
            bytes_accessed=bytes_accessed,
        ),
    )(xt, w_in.astype(jnp.float32), b_in2, w_hid, b_hid,
      w_out.astype(jnp.float32), b_out2)

    # Back to PyTorch layout: (N, out_features).
    return out_t[:, :n].T


def init_mlp_params(key, in_features, out_features, num_layers, num_neurons):
    """nn.Linear-style init: W is (fan_out, fan_in), b is (fan_out,),
    uniform +/- 1/sqrt(fan_in)."""
    dims = [(in_features, num_neurons)]
    dims += [(num_neurons, num_neurons)] * (num_layers - 1)
    dims += [(num_neurons, out_features)]
    params = []
    for (fan_in, fan_out) in dims:
        key, kw, kb = jax.random.split(key, 3)
        bound = 1.0 / math.sqrt(fan_in)
        w = jax.random.uniform(kw, (fan_out, fan_in), jnp.float32, -bound, bound)
        b = jax.random.uniform(kb, (fan_out,), jnp.float32, -bound, bound)
        params.append((w, b))
    return params


def mlp_forward_ref(params, x):
    """Pure-JAX reference (PyTorch semantics: y = x @ W.T + b)."""
    h = x
    for idx, (w, b) in enumerate(params):
        h = jnp.dot(h, w.T, precision=jax.lax.Precision.HIGHEST) + b
        if idx != len(params) - 1:
            h = jnp.tanh(h)
    return h


if __name__ == "__main__":
    # Small PINN-style shapes consistent with the module.
    in_features = 2
    out_features = 1
    num_layers = 3       # input layer + 2 hidden layers + output layer
    num_neurons = 32
    batch = 1000         # ragged on purpose: exercises padding + a 2-step grid

    key = jax.random.PRNGKey(0)
    key_x, key_p = jax.random.split(key)
    x = jax.random.normal(key_x, (batch, in_features), dtype=jnp.float32)
    params = init_mlp_params(key_p, in_features, out_features, num_layers,
                             num_neurons)

    fwd = jax.jit(mlp_forward)
    out = jax.block_until_ready(fwd(params, x))

    ref = mlp_forward_ref(params, x)
    assert out.shape == (batch, out_features)
    assert jnp.allclose(out, ref, atol=1e-4, rtol=1e-4), "mismatch vs reference"

    print("KERNEL_OK")
</pallas_src>

<mosaic_0001>
module attributes {stable_mosaic.version = 11 : i64} {
  func.func @_fused_mlp_kernel(%arg0: i32, %arg1: memref<2x512xf32, #tpu.memory_space<vmem>>, %arg2: memref<32x2xf32, #tpu.memory_space<vmem>>, %arg3: memref<32x1xf32, #tpu.memory_space<vmem>>, %arg4: memref<2x32x32xf32, #tpu.memory_space<vmem>>, %arg5: memref<2x32x1xf32, #tpu.memory_space<vmem>>, %arg6: memref<1x32xf32, #tpu.memory_space<vmem>>, %arg7: memref<1x1xf32, #tpu.memory_space<vmem>>, %arg8: memref<1x512xf32, #tpu.memory_space<vmem>>) attributes {dimension_semantics = [#tpu.dimension_semantics<parallel>], iteration_bounds = array<i64: 2>, scalar_prefetch = 0 : i64, scratch_operands = 0 : i64, tpu.core_type = #tpu.core_type<tc>, window_params = [{transform_indices = @transform_0, window_bounds = array<i64: 2, 512>}, {pipeline_mode = #tpu.pipeline_mode<synchronous>, transform_indices = @transform_1, window_bounds = array<i64: 32, 2>}, {pipeline_mode = #tpu.pipeline_mode<synchronous>, transform_indices = @transform_2, window_bounds = array<i64: 32, 1>}, {pipeline_mode = #tpu.pipeline_mode<synchronous>, transform_indices = @transform_3, window_bounds = array<i64: 2, 32, 32>}, {pipeline_mode = #tpu.pipeline_mode<synchronous>, transform_indices = @transform_4, window_bounds = array<i64: 2, 32, 1>}, {pipeline_mode = #tpu.pipeline_mode<synchronous>, transform_indices = @transform_5, window_bounds = array<i64: 1, 32>}, {pipeline_mode = #tpu.pipeline_mode<synchronous>, transform_indices = @transform_6, window_bounds = array<i64: 1, 1>}, {transform_indices = @transform_7, window_bounds = array<i64: 1, 512>}]} {
    %c0 = arith.constant 0 : index
    %c0_0 = arith.constant 0 : index
    %0 = vector.load %arg2[%c0, %c0_0] : memref<32x2xf32, #tpu.memory_space<vmem>>, vector<32x2xf32>
    %c0_1 = arith.constant 0 : index
    %c0_2 = arith.constant 0 : index
    %1 = vector.load %arg1[%c0_1, %c0_2] : memref<2x512xf32, #tpu.memory_space<vmem>>, vector<2x512xf32>
    %cst = arith.constant dense<0.000000e+00> : vector<32x512xf32>
    %2 = tpu.matmul %0, %1, %cst {dimension_numbers = #tpu.dot_dimension_numbers<[1], [0], [0], [1], [0, 0, 1, 1], [], []>} : vector<32x2xf32>, vector<2x512xf32>, vector<32x512xf32> -> vector<32x512xf32>
    %c0_3 = arith.constant 0 : index
    %c0_4 = arith.constant 0 : index
    %3 = vector.load %arg3[%c0_3, %c0_4] : memref<32x1xf32, #tpu.memory_space<vmem>>, vector<32x1xf32>
    %4 = vector.broadcast %3 : vector<32x1xf32> to vector<32x512xf32>
    %5 = arith.addf %2, %4 : vector<32x512xf32>
    %6 = math.tanh %5 : vector<32x512xf32>
    %c0_5 = arith.constant 0 : index
    %c0_6 = arith.constant 0 : index
    %c0_7 = arith.constant 0 : index
    %7 = vector.load %arg4[%c0_5, %c0_6, %c0_7] : memref<2x32x32xf32, #tpu.memory_space<vmem>>, vector<1x32x32xf32>
    %8 = vector.shape_cast %7 : vector<1x32x32xf32> to vector<32x32xf32>
    %cst_8 = arith.constant dense<0.000000e+00> : vector<32x512xf32>
    %9 = tpu.matmul %8, %6, %cst_8 {dimension_numbers = #tpu.dot_dimension_numbers<[1], [0], [0], [1], [0, 0, 1, 1], [], []>} : vector<32x32xf32>, vector<32x512xf32>, vector<32x512xf32> -> vector<32x512xf32>
    %c0_9 = arith.constant 0 : index
    %c0_10 = arith.constant 0 : index
    %c0_11 = arith.constant 0 : index
    %10 = vector.load %arg5[%c0_9, %c0_10, %c0_11] : memref<2x32x1xf32, #tpu.memory_space<vmem>>, vector<1x32x1xf32>
    %11 = vector.shape_cast %10 : vector<1x32x1xf32> to vector<32x1xf32>
    %12 = vector.broadcast %11 : vector<32x1xf32> to vector<32x512xf32>
    %13 = arith.addf %9, %12 : vector<32x512xf32>
    %14 = math.tanh %13 : vector<32x512xf32>
    %c1 = arith.constant 1 : index
    %c0_12 = arith.constant 0 : index
    %c0_13 = arith.constant 0 : index
    %15 = vector.load %arg4[%c1, %c0_12, %c0_13] : memref<2x32x32xf32, #tpu.memory_space<vmem>>, vector<1x32x32xf32>
    %16 = vector.shape_cast %15 : vector<1x32x32xf32> to vector<32x32xf32>
    %cst_14 = arith.constant dense<0.000000e+00> : vector<32x512xf32>
    %17 = tpu.matmul %16, %14, %cst_14 {dimension_numbers = #tpu.dot_dimension_numbers<[1], [0], [0], [1], [0, 0, 1, 1], [], []>} : vector<32x32xf32>, vector<32x512xf32>, vector<32x512xf32> -> vector<32x512xf32>
    %c1_15 = arith.constant 1 : index
    %c0_16 = arith.constant 0 : index
    %c0_17 = arith.constant 0 : index
    %18 = vector.load %arg5[%c1_15, %c0_16, %c0_17] : memref<2x32x1xf32, #tpu.memory_space<vmem>>, vector<1x32x1xf32>
    %19 = vector.shape_cast %18 : vector<1x32x1xf32> to vector<32x1xf32>
    %20 = vector.broadcast %19 : vector<32x1xf32> to vector<32x512xf32>
    %21 = arith.addf %17, %20 : vector<32x512xf32>
    %22 = math.tanh %21 : vector<32x512xf32>
    %c0_18 = arith.constant 0 : index
    %c0_19 = arith.constant 0 : index
    %23 = vector.load %arg6[%c0_18, %c0_19] : memref<1x32xf32, #tpu.memory_space<vmem>>, vector<1x32xf32>
    %cst_20 = arith.constant dense<0.000000e+00> : vector<1x512xf32>
    %24 = tpu.matmul %23, %22, %cst_20 {dimension_numbers = #tpu.dot_dimension_numbers<[1], [0], [0], [1], [0, 0, 1, 1], [], []>} : vector<1x32xf32>, vector<32x512xf32>, vector<1x512xf32> -> vector<1x512xf32>
    %c0_21 = arith.constant 0 : index
    %c0_22 = arith.constant 0 : index
    %25 = vector.load %arg7[%c0_21, %c0_22] : memref<1x1xf32, #tpu.memory_space<vmem>>, vector<1x1xf32>
    %26 = vector.broadcast %25 : vector<1x1xf32> to vector<1x512xf32>
    %27 = arith.addf %24, %26 : vector<1x512xf32>
    %c0_23 = arith.constant 0 : index
    %c0_24 = arith.constant 0 : index
    %28 = vector.load %arg8[%c0_23, %c0_24] : memref<1x512xf32, #tpu.memory_space<vmem>>, vector<1x512xf32>
    tpu.vector_store %arg8[%c0_23, %c0_24], %27 {strides = array<i32>} : memref<1x512xf32, #tpu.memory_space<vmem>>, vector<1x512xf32>,
    return
  }
  func.func @transform_0(%arg0: i32) -> (i32, i32) {
    %c0_i32 = arith.constant 0 : i32
    %c0_i32_0 = arith.constant 0 : i32
    return %c0_i32, %arg0 : i32, i32
  }
  func.func @transform_1(%arg0: i32) -> (i32, i32) {
    %c0_i32 = arith.constant 0 : i32
    %c0_i32_0 = arith.constant 0 : i32
    %c0_i32_1 = arith.constant 0 : i32
    return %c0_i32, %c0_i32_0 : i32, i32
  }
  func.func @transform_2(%arg0: i32) -> (i32, i32) {
    %c0_i32 = arith.constant 0 : i32
    %c0_i32_0 = arith.constant 0 : i32
    %c0_i32_1 = arith.constant 0 : i32
    return %c0_i32, %c0_i32_0 : i32, i32
  }
  func.func @transform_3(%arg0: i32) -> (i32, i32, i32) {
    %c0_i32 = arith.constant 0 : i32
    %c0_i32_0 = arith.constant 0 : i32
    %c0_i32_1 = arith.constant 0 : i32
    %c0_i32_2 = arith.constant 0 : i32
    return %c0_i32, %c0_i32_0, %c0_i32_1 : i32, i32, i32
  }
  func.func @transform_4(%arg0: i32) -> (i32, i32, i32) {
    %c0_i32 = arith.constant 0 : i32
    %c0_i32_0 = arith.constant 0 : i32
    %c0_i32_1 = arith.constant 0 : i32
    %c0_i32_2 = arith.constant 0 : i32
    return %c0_i32, %c0_i32_0, %c0_i32_1 : i32, i32, i32
  }
  func.func @transform_5(%arg0: i32) -> (i32, i32) {
    %c0_i32 = arith.constant 0 : i32
    %c0_i32_0 = arith.constant 0 : i32
    %c0_i32_1 = arith.constant 0 : i32
    return %c0_i32, %c0_i32_0 : i32, i32
  }
  func.func @transform_6(%arg0: i32) -> (i32, i32) {
    %c0_i32 = arith.constant 0 : i32
    %c0_i32_0 = arith.constant 0 : i32
    %c0_i32_1 = arith.constant 0 : i32
    return %c0_i32, %c0_i32_0 : i32, i32
  }
  func.func @transform_7(%arg0: i32) -> (i32, i32) {
    %c0_i32 = arith.constant 0 : i32
    %c0_i32_0 = arith.constant 0 : i32
    return %c0_i32, %arg0 : i32, i32
  }
}

</mosaic_0001>

<bundles_post_ra>
// kernel: mlp_forward.1
= control target key start
LH: loop header
LB: loop body
LE: loop exit
PB: predicated region body
PF: predicated region fallthrough
CT: control target
= control target key end

     0   :  { %s1518_s26 = smov 0   ;;  %s1673_s0 = inlined_call_operand.vmem [shape: f32[2,1024], index: 0, kind: input, shape index: {}]   ;;  %s1674_s1 = inlined_call_operand.vmem [shape: f32[32,2], index: 1, kind: input, shape index: {}]   ;;  %s1675_s2 = inlined_call_operand.vmem [shape: f32[32,1], index: 2, kind: input, shape index: {}]   ;;  %s1676_s3 = inlined_call_operand.vmem [shape: f32[2,32,32], index: 3, kind: input, shape index: {}]   ;;  %s1677_s4 = inlined_call_operand.vmem [shape: f32[2,32,1], index: 4, kind: input, shape index: {}]   ;;  %s1678_s5 = inlined_call_operand.vmem [shape: f32[1,32], index: 5, kind: input, shape index: {}]   ;;  %s1679_s6 = inlined_call_operand.<no memory space> [shape: f32[1,1], index: 6, kind: input, shape index: {}]   ;;  %s1680_s7 = inlined_call_operand.vmem [shape: f32[1,1024], index: 7, kind: output, shape index: {}]  }
   0x1   :  { %v12_v0 = vstv %s1679_s6 }
   0x2   :  { %13 = vst [vmem:[#allocation2] sm:$0x1] %v12_v0 }
   0x3 LB: > { %s1256_s27 = sadd.s32 4294967295, %s1469_s26   ;;  %p1260_p0 = scmp.ge.s32.totalorder %s1469_s26, 1  ;;  %s1469_s26 = sphi %s1518_s26, %s19_s26  }
   0x4   : > { %p240_p1 = scmp.lt.s32.totalorder %s1469_s26, 3 }
   0x6   : > { %p241_p2 = pnand %p1260_p0, %p240_p1 }
   0x7   : > { %s1261_s28 = sshll.u32 (!%p241_p2), %s1256_s27, 2  ;;  %v316_v1 = vlaneseq (!%p241_p2)  ;;  %v1471_v2 = vmov (!%p241_p2), 1983009808   ;;  %v1472_v4 = vmov (!%p241_p2), 0.0   ;;  %v1473_v6 = vmov (!%p241_p2), 0   ;;  %v287_v7 = vld [vmem:[%s1675_s2] sm:$0xff] (!%p241_p2) }
   0x8   : > { %244 = sbr.rel (%p241_p2) target bundleno = 983 (0x3d7), region = 48  ;;  %p272_p3 = scmp.lt.s32.totalorder (!%p241_p2), %s1261_s28, 7  ;;  %v314_v3 = vunpack.c.l.s4 (!%p241_p2), %v1471_v2  ;;  %415 = vmatprep.mubr.f32.mxu0 (!%p241_p2), %v1472_v4  ;;  %504 = vmatprep.mubr.f32.mxu1 (!%p241_p2), %v1472_v4  ;;  %v289_v9 = vld [vmem:[%s1675_s2 + $0x10] sm:$0xff] (!%p241_p2)  ;;  %v288_v10 = vld [vmem:[%s1675_s2 + $0x8] sm:$0xff] (!%p241_p2)  ;;  %v290_v12 = vld [vmem:[%s1675_s2 + $0x18] sm:$0xff] (!%p241_p2)  ;;  %vm342_vm0 = vcmask (!%p241_p2), 1041408  }
   0x9   : > { %v1529_v5 = vshrl.u32 (!%p241_p2), %v316_v1, 7  ;;  %1364 = vset.pattern.permute.xlu0 (!%p241_p2), %v1473_v6  ;;  %1365 = vset.pattern.permute.xlu1 (!%p241_p2), %v1473_v6  ;;  %v549_v16 = vld [vmem:[%s1677_s4] sm:$0xff] (!%p241_p2)  ;;  %v550_v17 = vld [vmem:[%s1677_s4 + $0x8] sm:$0xff] (!%p241_p2)  ;;  %vm329_vm1 = vcmask (!%p241_p2), 15360   ;;  %v551_v22 = vld [vmem:[%s1677_s4 + $0x10] sm:$0xff] (!%p241_p2)  ;;  %vm573_vm2 = vcmask (!%p241_p2), 261120  }
   0xa   : > { %v315_v8 = vunpack.c.0.s8 (!%p241_p2), %v314_v3  ;;  %293 = vperm.xlu0 (!%p241_p2), %1364, %v287_v7   ;;  %303 = vperm.xlu1 (!%p241_p2), %1365, %v289_v9   ;;  %v282_v20 = vld [vmem:[%s1674_s1] sm:$0xff] (!%p241_p2)  ;;  %v552_v23 = vld [vmem:[%s1677_s4 + $0x18] sm:$0xff] (!%p241_p2)  ;;  %v283_v24 = vld [vmem:[%s1674_s1 + $0x8] sm:$0xff] (!%p241_p2)  ;;  %vm1203_vm3 = vcmp.lt.s32.totalorder (!%p241_p2), %v316_v1, 512 }
   0xb   : > { %v1288_v25 = vld [vmem:[%s1677_s4 + $0x20] sm:$0xff] (!%p241_p2)  ;;  %v1289_v26 = vld [vmem:[%s1677_s4 + $0x28] sm:$0xff] (!%p241_p2)  ;;  %v284_v27 = vld [vmem:[%s1674_s1 + $0x10] sm:$0xff] (!%p241_p2) }
   0xc   : > { %v318_v11 = vsub.s32 (!%p241_p2), %v315_v8, %v1529_v5  ;;  %v1290_v28 = vld [vmem:[%s1677_s4 + $0x30] sm:$0xff] (!%p241_p2)  ;;  %v1291_v29 = vld [vmem:[%s1677_s4 + $0x38] sm:$0xff] (!%p241_p2)  ;;  %v1017_v31 = vld [vmem:[#allocation2] sm:$0x1] (!%p241_p2) }
   0xd   : > { %v285_v30 = vld [vmem:[%s1674_s1 + $0x18] sm:$0xff] (!%p241_p2) }
   0xe   : > { %298 = vperm.xlu0 (!%p241_p2), %1364, %v288_v10   ;;  %308 = vperm.xlu1 (!%p241_p2), %1365, %v290_v12  }
   0xf   : > { %s1682_s28 = smov (!%p272_p3, %s1261_s28), 7 }
  0x10   : > { %s1262_s11 = sshll.u32 %s1682_s28, 1  ;;  %s280_s17 = scalar_lea.vmem %s1680_s7, %s1682_s28 }
  0x11   : > { %s275_s16 = scalar_lea.vmem %s1673_s0, %s1262_s11 }
  0x12   : > { %v286_v13 = vld [vmem:[%s275_s16] sm:$0xff]  ;;  %555 = vperm.xlu0 %1364, %v549_v16   ;;  %560 = vperm.xlu1 %1365, %v550_v17  }
  0x13   : > { %v319_v14 = vrot.slane %v286_v13, %v318_v11  ;;  %v312_v15 = vcombine.high %v286_v13, %v286_v13 }
  0x15   : > { %v327_v18 = vcombine.high %v319_v14, %v319_v14  ;;  %v326_v19 = vrot.slane %v312_v15, %v318_v11 }
  0x16   : > { %565 = vperm.xlu0 %1364, %v551_v22   ;;  %570 = vperm.xlu1 %1365, %v552_v23  }
  0x17   : > { %1264 = vmatprep.subr.msk.mxu0 %vm342_vm0, %v327_v18  ;;  %v328_v21 = vcombine.high %v326_v19, %v326_v19 }
  0x18   : > { %1265 = vmatpush1.msk.msra.mxu0 %vm342_vm0, %v319_v14 }
  0x19   : > { %1266 = vmatmul.mubr.msk.f32.vlgmr.msra.gmra.mrb[0].mxu0 %vm329_vm1, %v282_v20  ;;  %1270 = vmatprep.subr.msk.mxu1 %vm342_vm0, %v328_v21 }
  0x1a   : > { %1271 = vmatpush1.msk.msra.mxu1 %vm342_vm0, %v326_v19  ;;  %421 = vmatprep.mubr.f32.mxu0 %v1472_v4 }
  0x1b   : > { %1272 = vmatmul.mubr.msk.f32.vlgmr.msra.gmra.mrb[0].mxu1 %vm329_vm1, %v282_v20  ;;  %792 = vperm.xlu0 %1364, %v1288_v25  }
  0x1c   : > { %510 = vmatprep.mubr.f32.mxu1 %v1472_v4  ;;  %797 = vperm.xlu1 %1365, %v1289_v26  }
  0x1d   : > { %1267 = vmatmul.mubr.msk.f32.gmra.mrb[2].mxu0 %vm329_vm1, %v283_v24 }
  0x1e   : > { %427 = vmatprep.mubr.f32.mxu0 %v1472_v4 }
  0x1f   : > { %1273 = vmatmul.mubr.msk.f32.gmra.mrb[2].mxu1 %vm329_vm1, %v283_v24  ;;  %802 = vperm.xlu0 %1364, %v1290_v28  }
  0x20   : > { %516 = vmatprep.mubr.f32.mxu1 %v1472_v4  ;;  %807 = vperm.xlu1 %1365, %v1291_v29  }
  0x21   : > { %1268 = vmatmul.mubr.msk.f32.gmra.mrb[4].mxu0 %vm329_vm1, %v284_v27 }
  0x22   : > { %433 = vmatprep.mubr.f32.mxu0 %v1472_v4 }
  0x23   : > { %1274 = vmatmul.mubr.msk.f32.gmra.mrb[4].mxu1 %vm329_vm1, %v284_v27  ;;  %1020 = vperm.xlu0 %1364, %v1017_v31   ;;  %v545_v31 = vld [vmem:[%s1676_s3] sm:$0xff] }
  0x24   : > { %522 = vmatprep.mubr.f32.mxu1 %v1472_v4 }
  0x25   : > { %1269 = vmatmul.mubr.msk.f32.gmra.mrb[6].mxu0 %vm329_vm1, %v285_v30 }
  0x26   : > { %650 = vmatprep.mubr.f32.mxu0 %v1472_v4 }
  0x27   : > { %1275 = vmatmul.mubr.msk.f32.gmra.mrb[6].mxu1 %vm329_vm1, %v285_v30 }
  0x28   : > { %739 = vmatprep.mubr.f32.mxu1 %v1472_v4 }
  0x89   : > { %v294_v32 = vpop.permute.xlu0 %293  ;;  %v304_v45 = vpop.permute.xlu1 %303 }
  0x8d   : > { %v299_v40 = vpop.permute.xlu0 %298  ;;  %v309_v58 = vpop.permute.xlu1 %308 }
  0xec   : > { %v417_v33 = vpop.f32.mrb[0].mxu0 }
  0xed   : > { %v418_v34 = vadd.f32 %v417_v33, %v294_v32  ;;  %v419_v35 = vpop.f32.mrb[1].mxu0  ;;  %v547_v33 = vld [vmem:[%s1676_s3 + $0x10] sm:$0xff] }
  0xee   : > { %v420_v36 = vadd.f32 %v419_v35, %v294_v32  ;;  %v506_v37 = vpop.f32.mrb[0].mxu1  ;;  %v556_v35 = vpop.permute.xlu0 %555 }
  0xef   : > { %1367 = vtanh.f32 %v418_v34  ;;  %v507_v38 = vadd.f32 %v506_v37, %v294_v32  ;;  %v508_v39 = vpop.f32.mrb[1].mxu1  ;;  %v548_v34 = vld [vmem:[%s1676_s3 + $0x18] sm:$0xff] }
  0xf0   : > { %1369 = vtanh.f32 %v420_v36  ;;  %v509_v41 = vadd.f32 %v508_v39, %v294_v32  ;;  %v423_v42 = vpop.f32.mrb[2].mxu0  ;;  %v546_v32 = vld [vmem:[%s1676_s3 + $0x8] sm:$0xff] }
  0xf1   : > { %1371 = vtanh.f32 %v507_v38  ;;  %v424_v43 = vadd.f32 %v423_v42, %v299_v40  ;;  %v425_v44 = vpop.f32.mrb[3].mxu0 }
  0xf2   : > { %1373 = vtanh.f32 %v509_v41  ;;  %v426_v46 = vadd.f32 %v425_v44, %v299_v40  ;;  %v512_v47 = vpop.f32.mrb[2].mxu1 }
  0xf3   : > { %1375 = vtanh.f32 %v424_v43  ;;  %v513_v48 = vadd.f32 %v512_v47, %v299_v40  ;;  %v514_v49 = vpop.f32.mrb[3].mxu1  ;;  %v561_v43 = vpop.permute.xlu1 %560 }
  0xf4   : > { %1377 = vtanh.f32 %v426_v46  ;;  %v515_v50 = vadd.f32 %v514_v49, %v299_v40  ;;  %v429_v51 = vpop.f32.mrb[4].mxu0 }
  0xf5   : > { %1379 = vtanh.f32 %v513_v48  ;;  %v430_v52 = vadd.f32 %v429_v51, %v304_v45  ;;  %v431_v53 = vpop.f32.mrb[5].mxu0 }
  0xf6   : > { %1381 = vtanh.f32 %v515_v50  ;;  %v432_v54 = vadd.f32 %v431_v53, %v304_v45  ;;  %v518_v55 = vpop.f32.mrb[4].mxu1 }
  0xf7   : > { %1383 = vtanh.f32 %v430_v52  ;;  %v519_v56 = vadd.f32 %v518_v55, %v304_v45  ;;  %v520_v57 = vpop.f32.mrb[5].mxu1  ;;  %v566_v52 = vpop.permute.xlu0 %565 }
  0xf8   : > { %1385 = vtanh.f32 %v432_v54  ;;  %v521_v59 = vadd.f32 %v520_v57, %v304_v45  ;;  %v435_v60 = vpop.f32.mrb[6].mxu0 }
  0xf9   : > { %v1368_v61 = vpop.eup %1367  ;;  %1387 = vtanh.f32 %v519_v56  ;;  %v436_v62 = vadd.f32 %v435_v60, %v309_v58  ;;  %v437_v63 = vpop.f32.mrb[7].mxu0 }
  0xfa   : > { %v1370_v0 = vpop.eup %1369  ;;  %1389 = vtanh.f32 %v521_v59  ;;  %v438_v2 = vadd.f32 %v437_v63, %v309_v58  ;;  %v524_v3 = vpop.f32.mrb[6].mxu1 }
  0xfb   : > { %v1372_v6 = vpop.eup %1371  ;;  %1391 = vtanh.f32 %v436_v62  ;;  %v525_v7 = vadd.f32 %v524_v3, %v309_v58  ;;  %v526_v8 = vpop.f32.mrb[7].mxu1 }
  0xfc   : > { %v1374_v9 = vpop.eup %1373  ;;  %1393 = vtanh.f32 %v438_v2  ;;  %v527_v10 = vadd.f32 %v526_v8, %v309_v58 }
  0xfd   : > { %v1376_v11 = vpop.eup %1375  ;;  %1395 = vtanh.f32 %v525_v7 }
  0xfe   : > { %v1378_v12 = vpop.eup %1377  ;;  %1397 = vtanh.f32 %v527_v10  ;;  %v1306_v13 = vpack.c.bf16 %v1376_v11, %v1368_v61  ;;  %v571_v61 = vpop.permute.xlu1 %570 }
  0xff   : > { %v1380_v14 = vpop.eup %1379  ;;  %v1304_v15 = vpack.c.bf16 %v1378_v12, %v1370_v0 }
 0x100   : > { %v1382_v16 = vpop.eup %1381  ;;  %v1314_v17 = vpack.c.bf16 %v1380_v14, %v1372_v6 }
 0x101   : > { %v1384_v18 = vpop.eup %1383  ;;  %1305 = vmatprep.subr.bf16.mxu0 %v1304_v15  ;;  %v1312_v19 = vpack.c.bf16 %v1382_v16, %v1374_v9 }
 0x102   : > { %v1386_v20 = vpop.eup %1385  ;;  %1307 = vmatpush1.bf16.msra.mxu0 %v1306_v13 }
 0x103   : > { %v1388_v21 = vpop.eup %1387  ;;  %1313 = vmatprep.subr.bf16.mxu1 %v1312_v19 }
 0x104   : > { %v1390_v22 = vpop.eup %1389  ;;  %1315 = vmatpush1.bf16.msra.mxu1 %v1314_v17 }
 0x105   : > { %v1392_v23 = vpop.eup %1391 }
 0x106   : > { %v1394_v24 = vpop.eup %1393  ;;  %v1310_v25 = vpack.c.bf16 %v1392_v23, %v1384_v18 }
 0x107   : > { %v1396_v26 = vpop.eup %1395  ;;  %v1308_v27 = vpack.c.bf16 %v1394_v24, %v1386_v20 }
 0x108   : > { %v1398_v28 = vpop.eup %1397  ;;  %v1318_v29 = vpack.c.bf16 %v1396_v26, %v1388_v21 }
 0x109   : > { %1309 = vmatprep.subr.bf16.mxu0 %v1308_v27  ;;  %v1316_v30 = vpack.c.bf16 %v1398_v28, %v1390_v22 }
 0x10a   : > { %1311 = vmatpush1.bf16.msra.mxu0 %v1310_v25 }
 0x10b   : > { %1317 = vmatprep.subr.bf16.mxu1 %v1316_v30 }
 0x10c   : > { %1319 = vmatpush1.bf16.msra.mxu1 %v1318_v29 }
 0x10d   : > { %1276 = vmatmul.mubr.msk.f32.vlgmr.msra.gmra.mrb[8].mxu0 %vm573_vm2, %v545_v31 }
 0x10e   : > { %656 = vmatprep.mubr.f32.mxu0 %v1472_v4 }
 0x10f   : > { %1280 = vmatmul.mubr.msk.f32.vlgmr.msra.gmra.mrb[8].mxu1 %vm573_vm2, %v545_v31 }
 0x110   : > { %745 = vmatprep.mubr.f32.mxu1 %v1472_v4 }
 0x111   : > { %1277 = vmatmul.mubr.msk.f32.gmra.mrb[10].mxu0 %vm573_vm2, %v546_v32 }
 0x112   : > { %662 = vmatprep.mubr.f32.mxu0 %v1472_v4 }
 0x113   : > { %1281 = vmatmul.mubr.msk.f32.gmra.mrb[10].mxu1 %vm573_vm2, %v546_v32 }
 0x114   : > { %751 = vmatprep.mubr.f32.mxu1 %v1472_v4 }
 0x115   : > { %1278 = vmatmul.mubr.msk.f32.gmra.mrb[12].mxu0 %vm573_vm2, %v547_v33 }
 0x116   : > { %668 = vmatprep.mubr.f32.mxu0 %v1472_v4 }
 0x117   : > { %1282 = vmatmul.mubr.msk.f32.gmra.mrb[12].mxu1 %vm573_vm2, %v547_v33 }
 0x118   : > { %757 = vmatprep.mubr.f32.mxu1 %v1472_v4 }
 0x119   : > { %1279 = vmatmul.mubr.msk.f32.gmra.mrb[14].mxu0 %vm573_vm2, %v548_v34 }
 0x11a   : > { %886 = vmatprep.mubr.f32.mxu0 %v1472_v4 }
 0x11b   : > { %1283 = vmatmul.mubr.msk.f32.gmra.mrb[14].mxu1 %vm573_vm2, %v548_v34  ;;  %v1284_v34 = vld [vmem:[%s1676_s3 + $0x20] sm:$0xff] }
 0x11c   : > { %975 = vmatprep.mubr.f32.mxu1 %v1472_v4 }
 0x1e0   : > { %v652_v36 = vpop.f32.mrb[8].mxu0 }
 0x1e1   : > { %v653_v37 = vadd.f32 %v652_v36, %v556_v35  ;;  %v654_v38 = vpop.f32.mrb[9].mxu0  ;;  %v1286_v36 = vld [vmem:[%s1676_s3 + $0x30] sm:$0xff] }
 0x1e2   : > { %v655_v39 = vadd.f32 %v654_v38, %v556_v35  ;;  %v741_v40 = vpop.f32.mrb[8].mxu1  ;;  %v793_v38 = vpop.permute.xlu0 %792 }
 0x1e3   : > { %1399 = vtanh.f32 %v653_v37  ;;  %v742_v41 = vadd.f32 %v741_v40, %v556_v35  ;;  %v743_v42 = vpop.f32.mrb[9].mxu1  ;;  %v1287_v37 = vld [vmem:[%s1676_s3 + $0x38] sm:$0xff] }
 0x1e4   : > { %1401 = vtanh.f32 %v655_v39  ;;  %v744_v44 = vadd.f32 %v743_v42, %v556_v35  ;;  %v658_v45 = vpop.f32.mrb[10].mxu0  ;;  %v1285_v35 = vld [vmem:[%s1676_s3 + $0x28] sm:$0xff] }
 0x1e5   : > { %1403 = vtanh.f32 %v742_v41  ;;  %v659_v46 = vadd.f32 %v658_v45, %v561_v43  ;;  %v660_v47 = vpop.f32.mrb[11].mxu0 }
 0x1e6   : > { %1405 = vtanh.f32 %v744_v44  ;;  %v661_v48 = vadd.f32 %v660_v47, %v561_v43  ;;  %v747_v49 = vpop.f32.mrb[10].mxu1 }
 0x1e7   : > { %1407 = vtanh.f32 %v659_v46  ;;  %v748_v50 = vadd.f32 %v747_v49, %v561_v43  ;;  %v749_v51 = vpop.f32.mrb[11].mxu1  ;;  %v798_v46 = vpop.permute.xlu1 %797 }
 0x1e8   : > { %1409 = vtanh.f32 %v661_v48  ;;  %v750_v53 = vadd.f32 %v749_v51, %v561_v43  ;;  %v664_v54 = vpop.f32.mrb[12].mxu0 }
 0x1e9   : > { %1411 = vtanh.f32 %v748_v50  ;;  %v665_v55 = vadd.f32 %v664_v54, %v566_v52  ;;  %v666_v56 = vpop.f32.mrb[13].mxu0  ;;  %v803_v54 = vpop.permute.xlu0 %802 }
 0x1ea   : > { %1413 = vtanh.f32 %v750_v53  ;;  %v667_v57 = vadd.f32 %v666_v56, %v566_v52  ;;  %v753_v58 = vpop.f32.mrb[12].mxu1 }
 0x1eb   : > { %1415 = vtanh.f32 %v665_v55  ;;  %v754_v59 = vadd.f32 %v753_v58, %v566_v52  ;;  %v755_v60 = vpop.f32.mrb[13].mxu1 }
 0x1ec   : > { %1417 = vtanh.f32 %v667_v57  ;;  %v756_v62 = vadd.f32 %v755_v60, %v566_v52  ;;  %v670_v63 = vpop.f32.mrb[14].mxu0 }
 0x1ed   : > { %v1400_v0 = vpop.eup %1399  ;;  %1419 = vtanh.f32 %v754_v59  ;;  %v671_v2 = vadd.f32 %v670_v63, %v571_v61  ;;  %v672_v3 = vpop.f32.mrb[15].mxu0 }
 0x1ee   : > { %v1402_v6 = vpop.eup %1401  ;;  %1421 = vtanh.f32 %v756_v62  ;;  %v673_v7 = vadd.f32 %v672_v3, %v571_v61  ;;  %v759_v8 = vpop.f32.mrb[14].mxu1 }
 0x1ef   : > { %v1404_v9 = vpop.eup %1403  ;;  %1423 = vtanh.f32 %v671_v2  ;;  %v760_v10 = vadd.f32 %v759_v8, %v571_v61  ;;  %v761_v11 = vpop.f32.mrb[15].mxu1 }
 0x1f0   : > { %v1406_v12 = vpop.eup %1405  ;;  %1425 = vtanh.f32 %v673_v7  ;;  %v762_v13 = vadd.f32 %v761_v11, %v571_v61  ;;  %v808_v63 = vpop.permute.xlu1 %807 }
 0x1f1   : > { %v1408_v14 = vpop.eup %1407  ;;  %1427 = vtanh.f32 %v760_v10 }
 0x1f2   : > { %v1410_v15 = vpop.eup %1409  ;;  %1429 = vtanh.f32 %v762_v13  ;;  %v1322_v16 = vpack.c.bf16 %v1408_v14, %v1400_v0 }
 0x1f3   : > { %v1412_v17 = vpop.eup %1411  ;;  %v1320_v18 = vpack.c.bf16 %v1410_v15, %v1402_v6 }
 0x1f4   : > { %v1414_v19 = vpop.eup %1413  ;;  %v1330_v20 = vpack.c.bf16 %v1412_v17, %v1404_v9 }
 0x1f5   : > { %v1416_v21 = vpop.eup %1415  ;;  %1321 = vmatprep.subr.bf16.mxu0 %v1320_v18  ;;  %v1328_v22 = vpack.c.bf16 %v1414_v19, %v1406_v12 }
 0x1f6   : > { %v1418_v23 = vpop.eup %1417  ;;  %1323 = vmatpush1.bf16.msra.mxu0 %v1322_v16 }
 0x1f7   : > { %v1420_v24 = vpop.eup %1419  ;;  %1329 = vmatprep.subr.bf16.mxu1 %v1328_v22 }
 0x1f8   : > { %v1422_v25 = vpop.eup %1421  ;;  %1331 = vmatpush1.bf16.msra.mxu1 %v1330_v20 }
 0x1f9   : > { %v1424_v26 = vpop.eup %1423 }
 0x1fa   : > { %v1426_v27 = vpop.eup %1425  ;;  %v1326_v28 = vpack.c.bf16 %v1424_v26, %v1416_v21 }
 0x1fb   : > { %v1428_v29 = vpop.eup %1427  ;;  %v1324_v30 = vpack.c.bf16 %v1426_v27, %v1418_v23 }
 0x1fc   : > { %v1430_v31 = vpop.eup %1429  ;;  %v1334_v32 = vpack.c.bf16 %v1428_v29, %v1420_v24 }
 0x1fd   : > { %1325 = vmatprep.subr.bf16.mxu0 %v1324_v30  ;;  %v1332_v33 = vpack.c.bf16 %v1430_v31, %v1422_v25 }
 0x1fe   : > { %1327 = vmatpush1.bf16.msra.mxu0 %v1326_v28 }
 0x1ff   : > { %1333 = vmatprep.subr.bf16.mxu1 %v1332_v33 }
 0x200   : > { %1335 = vmatpush1.bf16.msra.mxu1 %v1334_v32 }
 0x201   : > { %1292 = vmatmul.mubr.msk.f32.vlgmr.msra.gmra.mrb[16].mxu0 %vm573_vm2, %v1284_v34 }
 0x202   : > { %892 = vmatprep.mubr.f32.mxu0 %v1472_v4 }
 0x203   : > { %1296 = vmatmul.mubr.msk.f32.vlgmr.msra.gmra.mrb[16].mxu1 %vm573_vm2, %v1284_v34 }
 0x204   : > { %981 = vmatprep.mubr.f32.mxu1 %v1472_v4 }
 0x205   : > { %1293 = vmatmul.mubr.msk.f32.gmra.mrb[18].mxu0 %vm573_vm2, %v1285_v35 }
 0x206   : > { %898 = vmatprep.mubr.f32.mxu0 %v1472_v4 }
 0x207   : > { %1297 = vmatmul.mubr.msk.f32.gmra.mrb[18].mxu1 %vm573_vm2, %v1285_v35 }
 0x208   : > { %987 = vmatprep.mubr.f32.mxu1 %v1472_v4 }
 0x209   : > { %1294 = vmatmul.mubr.msk.f32.gmra.mrb[20].mxu0 %vm573_vm2, %v1286_v36 }
 0x20a   : > { %904 = vmatprep.mubr.f32.mxu0 %v1472_v4 }
 0x20b   : > { %1298 = vmatmul.mubr.msk.f32.gmra.mrb[20].mxu1 %vm573_vm2, %v1286_v36  ;;  %v1016_v36 = vld [vmem:[%s1678_s5] sm:$0x1] }
 0x20c   : > { %993 = vmatprep.mubr.f32.mxu1 %v1472_v4 }
 0x20d   : > { %1295 = vmatmul.mubr.msk.f32.gmra.mrb[22].mxu0 %vm573_vm2, %v1287_v37 }
 0x20e   : > { %1094 = vmatprep.mubr.f32.mxu0 %v1472_v4 }
 0x20f   : > { %1299 = vmatmul.mubr.msk.f32.gmra.mrb[22].mxu1 %vm573_vm2, %v1287_v37  ;;  %v1025_v37 = vsub.s32 0, %v1529_v5 }
 0x210   : > { %1165 = vmatprep.mubr.f32.mxu1 %v1472_v4 }
 0x2d4   : > { %v888_v39 = vpop.f32.mrb[16].mxu0 }
 0x2d5   : > { %v889_v40 = vadd.f32 %v888_v39, %v793_v38  ;;  %v890_v41 = vpop.f32.mrb[17].mxu0  ;;  %v1474_v39 = vmov 1966171168  }
 0x2d6   : > { %v891_v42 = vadd.f32 %v890_v41, %v793_v38  ;;  %v977_v43 = vpop.f32.mrb[16].mxu1 }
 0x2d7   : > { %1431 = vtanh.f32 %v889_v40  ;;  %v978_v44 = vadd.f32 %v977_v43, %v793_v38  ;;  %v979_v45 = vpop.f32.mrb[17].mxu1  ;;  %v1179_v40 = vunpack.c.l.s4 %v1474_v39 }
 0x2d8   : > { %1433 = vtanh.f32 %v891_v42  ;;  %v980_v47 = vadd.f32 %v979_v45, %v793_v38  ;;  %v894_v48 = vpop.f32.mrb[18].mxu0  ;;  %v1021_v38 = vpop.permute.xlu0 %1020 }
 0x2d9   : > { %1435 = vtanh.f32 %v978_v44  ;;  %v895_v49 = vadd.f32 %v894_v48, %v798_v46  ;;  %v896_v50 = vpop.f32.mrb[19].mxu0  ;;  %v1026_v41 = vrot.slane %v1021_v38, %v1025_v37  ;;  %v1180_v43 = vunpack.c.0.s8 %v1179_v40 }
 0x2da   : > { %1437 = vtanh.f32 %v980_v47  ;;  %v897_v51 = vadd.f32 %v896_v50, %v798_v46  ;;  %v983_v52 = vpop.f32.mrb[18].mxu1 }
 0x2db   : > { %1439 = vtanh.f32 %v895_v49  ;;  %v984_v4 = vadd.f32 %v983_v52, %v798_v46  ;;  %v985_v53 = vpop.f32.mrb[19].mxu1 }
 0x2dc   : > { %1441 = vtanh.f32 %v897_v51  ;;  %v986_v55 = vadd.f32 %v985_v53, %v798_v46  ;;  %v900_v56 = vpop.f32.mrb[20].mxu0  ;;  %v1183_v51 = vsub.s32 %v1180_v43, %v1529_v5 }
 0x2dd   : > { %1443 = vtanh.f32 %v984_v4  ;;  %v901_v57 = vadd.f32 %v900_v56, %v803_v54  ;;  %v902_v58 = vpop.f32.mrb[21].mxu0 }
 0x2de   : > { %1445 = vtanh.f32 %v986_v55  ;;  %v903_v59 = vadd.f32 %v902_v58, %v803_v54  ;;  %v989_v60 = vpop.f32.mrb[20].mxu1 }
 0x2df   : > { %1447 = vtanh.f32 %v901_v57  ;;  %v990_v61 = vadd.f32 %v989_v60, %v803_v54  ;;  %v991_v62 = vpop.f32.mrb[21].mxu1 }
 0x2e0   : > { %1449 = vtanh.f32 %v903_v59  ;;  %v992_v0 = vadd.f32 %v991_v62, %v803_v54  ;;  %v906_v2 = vpop.f32.mrb[22].mxu0 }
 0x2e1   : > { %v1432_v3 = vpop.eup %1431  ;;  %1451 = vtanh.f32 %v990_v61  ;;  %v907_v6 = vadd.f32 %v906_v2, %v808_v63  ;;  %v908_v7 = vpop.f32.mrb[23].mxu0 }
 0x2e2   : > { %v1434_v8 = vpop.eup %1433  ;;  %1453 = vtanh.f32 %v992_v0  ;;  %v909_v9 = vadd.f32 %v908_v7, %v808_v63  ;;  %v995_v10 = vpop.f32.mrb[22].mxu1 }
 0x2e3   : > { %v1436_v11 = vpop.eup %1435  ;;  %1455 = vtanh.f32 %v907_v6  ;;  %v996_v12 = vadd.f32 %v995_v10, %v808_v63  ;;  %v997_v13 = vpop.f32.mrb[23].mxu1 }
 0x2e4   : > { %v1438_v14 = vpop.eup %1437  ;;  %1457 = vtanh.f32 %v909_v9  ;;  %v998_v15 = vadd.f32 %v997_v13, %v808_v63 }
 0x2e5   : > { %v1440_v16 = vpop.eup %1439  ;;  %1459 = vtanh.f32 %v996_v12 }
 0x2e6   : > { %v1442_v17 = vpop.eup %1441  ;;  %1461 = vtanh.f32 %v998_v15  ;;  %v1338_v18 = vpack.c.bf16 %v1440_v16, %v1432_v3 }
 0x2e7   : > { %v1444_v19 = vpop.eup %1443  ;;  %v1336_v20 = vpack.c.bf16 %v1442_v17, %v1434_v8 }
 0x2e8   : > { %v1446_v21 = vpop.eup %1445  ;;  %v1346_v22 = vpack.c.bf16 %v1444_v19, %v1436_v11 }
 0x2e9   : > { %v1448_v23 = vpop.eup %1447  ;;  %1337 = vmatprep.subr.bf16.mxu0 %v1336_v20  ;;  %v1344_v24 = vpack.c.bf16 %v1446_v21, %v1438_v14 }
 0x2ea   : > { %v1450_v25 = vpop.eup %1449  ;;  %1339 = vmatpush1.bf16.msra.mxu0 %v1338_v18 }
 0x2eb   : > { %v1452_v26 = vpop.eup %1451  ;;  %1345 = vmatprep.subr.bf16.mxu1 %v1344_v24 }
 0x2ec   : > { %v1454_v27 = vpop.eup %1453  ;;  %1347 = vmatpush1.bf16.msra.mxu1 %v1346_v22 }
 0x2ed   : > { %v1456_v28 = vpop.eup %1455 }
 0x2ee   : > { %v1458_v29 = vpop.eup %1457  ;;  %v1342_v30 = vpack.c.bf16 %v1456_v28, %v1448_v23 }
 0x2ef   : > { %v1460_v31 = vpop.eup %1459  ;;  %v1340_v32 = vpack.c.bf16 %v1458_v29, %v1450_v25 }
 0x2f0   : > { %v1462_v33 = vpop.eup %1461  ;;  %v1350_v34 = vpack.c.bf16 %v1460_v31, %v1452_v26 }
 0x2f1   : > { %1341 = vmatprep.subr.bf16.mxu0 %v1340_v32  ;;  %v1348_v35 = vpack.c.bf16 %v1462_v33, %v1454_v27 }
 0x2f2   : > { %1343 = vmatpush1.bf16.msra.mxu0 %v1342_v30 }
 0x2f3   : > { %1349 = vmatprep.subr.bf16.mxu1 %v1348_v35 }
 0x2f4   : > { %1351 = vmatpush1.bf16.msra.mxu1 %v1350_v34 }
 0x2f5   : > { %1300 = vmatmul.mubr.msk.f32.vlgmr.msra.gmra.mrb[24].mxu0 %vm573_vm2, %v1016_v36 }
 0x2f7   : > { %1301 = vmatmul.mubr.msk.f32.vlgmr.msra.gmra.mrb[24].mxu1 %vm573_vm2, %v1016_v36 }
 0x3c8   : > { %v1096_v42 = vpop.f32.mrb[24].mxu0 }
 0x3c9   : > { %v1097_v44 = vadd.f32 %v1096_v42, %v1026_v41  ;;  %v1098_v45 = vpop.f32.mrb[25].mxu0 }
 0x3ca   : > { %v1099_v46 = vadd.f32 %v1098_v45, %v1026_v41  ;;  %v1167_v47 = vpop.f32.mrb[24].mxu1 }
 0x3cb   : > { %v1168_v48 = vadd.f32 %v1167_v47, %v1026_v41  ;;  %v1169_v49 = vpop.f32.mrb[25].mxu1 }
 0x3cc   : > { %v1176_v50 = vcombine.low %v1097_v44, %v1099_v46  ;;  %v1170_v52 = vadd.f32 %v1169_v49, %v1026_v41 }
 0x3ce   : > { %v1177_v4 = vcombine.low %v1168_v48, %v1170_v52  ;;  %v1184_v53 = vrot.slane %v1176_v50, %v1183_v51 }
 0x3d0   : > { %v1191_v54 = vrot.slane %v1177_v4, %v1183_v51 }
 0x3d2   : > { %v1192_v55 = vcombine.low %v1184_v53, %v1191_v54 }
 0x3d4   : > { %v1199_v56 = vrot.slane %v1192_v55, %v1183_v51 }
 0x3d6   : > { %1205 = vst.msk [vmem:[%s280_s17] sm:$0xf] %vm1203_vm3, %v1199_v56 }
 0x3d7 PF: > { %s19_s26 = sadd.s32 1, %s1469_s26  }
 0x3d8   : > { %p16_p4 = scmp.ge.s32.totalorder %s19_s26, 4  }
 0x3da   :  { %18 = sbr.rel (!%p16_p4) target bundleno = 3 (0x3), region = 80 }

</bundles_post_ra>
